<compile_context>
chip_gen: v7x
topology: tpu7x:2x2x1
jax: 0.10.0
libtpu: 0.0.40
codegen_flags: <defaults>
</compile_context>

<pallas_src>
import jax
import jax.numpy as jnp
import numpy as np
from jax.experimental import pallas as pl
from jax.experimental.pallas import tpu as pltpu


def _round_up(v, m):
    return (v + m - 1) // m * m


def _vmem_limit_bytes(per_step_bytes):
    # 2x for double buffering + 4 MiB slack; clamp to [16 MiB, 48 MiB]
    # (48 MiB keeps headroom under v7x's 64 MiB physical VMEM).
    want = 2 * per_step_bytes + (4 << 20)
    return int(min(max(want, 16 << 20), 48 << 20))


# ----------------------------------------------------------------------------
# Kernel 1: the full GraphConv stack for one element view.
# grid = (n_el, n_layers); view axis "parallel", layer axis "arbitrary".
# The output block is the layer carry (its block index is constant across the
# layer axis, so it stays VMEM-resident for the whole view).
# ----------------------------------------------------------------------------
def gcn_stack_kernel(x_ref, a_ref, w_ref, b_ref, out_ref):
    layer = pl.program_id(1)

    # Seed the carry with this view's input features at layer 0.
    @pl.when(layer == 0)
    def _():
        out_ref[0] = x_ref[0]

    h = out_ref[0]                                             # bf16 [n_pad, f_pad]

    # H @ W on the MXU: bf16 operands, f32 accumulation.
    xw = jnp.dot(h, w_ref[0], preferred_element_type=jnp.float32)

    # Aggregation with the pre-normalized adjacency: A_hat @ (H W).
    agg = jnp.dot(a_ref[0, 0], xw.astype(jnp.bfloat16),
                  preferred_element_type=jnp.float32)

    h_new = jnp.maximum(agg + b_ref[0], 0.0)                   # bias + relu (f32, VPU)
    out_ref[0] = h_new.astype(jnp.bfloat16)                    # carry / final output


# ----------------------------------------------------------------------------
# Kernel 2: FusionLayer head for one tile of node rows.
# fused = sum_e fw[e] * H[e];  logits = fused @ W_out + b_out;  log_softmax.
# ----------------------------------------------------------------------------
def fusion_head_kernel(fw_ref, h_ref, w_ref, b_ref, o_ref):
    n_el = h_ref.shape[0]
    # Hoist the fusion-weight scalar loads (SMEM) out of the accumulation.
    fws = [fw_ref[e] for e in range(n_el)]
    fused = fws[0] * h_ref[0].astype(jnp.float32)
    for e in range(1, n_el):
        fused = fused + fws[e] * h_ref[e].astype(jnp.float32)

    logits = jnp.dot(fused.astype(jnp.bfloat16), w_ref[...],
                     preferred_element_type=jnp.float32)
    logits = logits + b_ref[...]          # padded class lanes carry -1e9 bias
    m = jnp.max(logits, axis=-1, keepdims=True)
    lse = m + jnp.log(jnp.sum(jnp.exp(logits - m), axis=-1, keepdims=True))
    o_ref[...] = logits - lse             # F.log_softmax(dim=-1)


# ----------------------------------------------------------------------------
# Host-side preparation: padding to (8,128)-friendly shapes, degree-normalized
# adjacency (host-folded), bf16 casts.
# ----------------------------------------------------------------------------
def _prepare(adj, x, weights, biases, w_out, b_out):
    num_layers, n_el, n_per, _ = adj.shape
    in_dim = x.shape[-1]
    hidden = weights[-1].shape[-1]
    n_classes = w_out.shape[-1]

    n_pad = _round_up(n_per, 128)
    f_pad = _round_up(max(in_dim, hidden), 128)
    c_pad = _round_up(n_classes, 128)

    a = jnp.pad(adj.astype(jnp.float32),
                ((0, 0), (0, 0), (0, n_pad - n_per), (0, n_pad - n_per)))
    # DGL norm='both', folded into A on the host (degrees clamped to 1 so padded /
    # isolated nodes get scale 1; their A rows/cols are zero anyway).
    d_in = jnp.maximum(jnp.sum(a, axis=-1), 1.0)    # [L, E, Np]  (row sums: in-deg)
    d_out = jnp.maximum(jnp.sum(a, axis=-2), 1.0)   # [L, E, Np]  (col sums: out-deg)
    a_hat = a * jax.lax.rsqrt(d_in)[..., :, None] * jax.lax.rsqrt(d_out)[..., None, :]
    a_bf = a_hat.astype(jnp.bfloat16)

    x_bf = jnp.pad(x.astype(jnp.float32),
                   ((0, 0), (0, n_pad - n_per), (0, f_pad - in_dim))
                   ).astype(jnp.bfloat16)

    w_st = jnp.zeros((num_layers, f_pad, f_pad), jnp.float32)
    b_st = jnp.zeros((num_layers, 1, f_pad), jnp.float32)
    for l, (w, b) in enumerate(zip(weights, biases)):
        w_st = w_st.at[l, :w.shape[0], :w.shape[1]].set(w)
        b_st = b_st.at[l, 0, :b.shape[0]].set(b)
    w_bf = w_st.astype(jnp.bfloat16)

    wo_bf = (jnp.zeros((f_pad, c_pad), jnp.float32)
             .at[:hidden, :n_classes].set(w_out).astype(jnp.bfloat16))
    # Padded class lanes get a large negative bias so log_softmax ignores them.
    bo = jnp.full((1, c_pad), -1e9, jnp.float32).at[0, :n_classes].set(b_out)

    dims = dict(num_layers=num_layers, n_el=n_el, n_per=n_per, n_classes=n_classes,
                n_pad=n_pad, f_pad=f_pad, c_pad=c_pad)
    return a_bf, x_bf, w_bf, b_st, wo_bf, bo, dims


# ----------------------------------------------------------------------------
# Forward pass (2 pallas_calls: fused GCN stack, then fusion head).
# ----------------------------------------------------------------------------
def mgcn_forward(adj, x, weights, biases, fusion_weights, w_out, b_out):
    a_bf, x_bf, w_bf, b_st, wo_bf, bo, d = _prepare(
        adj, x, weights, biases, w_out, b_out)
    L, E = d["num_layers"], d["n_el"]
    n_pad, f_pad, c_pad = d["n_pad"], d["f_pad"], d["c_pad"]

    # --- GraphConv stack: all layers for all views in one call ----------------
    gcn_step_bytes = (n_pad * f_pad * 2          # x block (bf16)
                      + n_pad * n_pad * 2        # A_hat block (bf16)
                      + f_pad * f_pad * 2        # W block (bf16)
                      + f_pad * 4                # bias (f32)
                      + n_pad * f_pad * 2)       # output / carried H block (bf16)
    h = pl.pallas_call(
        gcn_stack_kernel,
        out_shape=jax.ShapeDtypeStruct((E, n_pad, f_pad), jnp.bfloat16),
        grid_spec=pltpu.PrefetchScalarGridSpec(
            num_scalar_prefetch=0,
            grid=(E, L),
            in_specs=[
                pl.BlockSpec((1, n_pad, f_pad), lambda e, l: (e, 0, 0)),        # X (per view)
                pl.BlockSpec((1, 1, n_pad, n_pad), lambda e, l: (l, e, 0, 0)),  # A_hat block
                pl.BlockSpec((1, f_pad, f_pad), lambda e, l: (l, 0, 0)),        # W (per layer)
                pl.BlockSpec((1, 1, f_pad), lambda e, l: (l, 0, 0)),            # b (per layer)
            ],
            out_specs=pl.BlockSpec((1, n_pad, f_pad), lambda e, l: (e, 0, 0)),
        ),
        compiler_params=pltpu.CompilerParams(
            dimension_semantics=("parallel", "arbitrary"),
            vmem_limit_bytes=_vmem_limit_bytes(gcn_step_bytes)),
    )(x_bf, a_bf, w_bf, b_st)

    # --- Fusion head: weighted view fusion + linear + log_softmax -------------
    # >=2 row tiles so both v7x TCs have work; big tiles keep per-step overhead low.
    tile_n = n_pad // 2 if n_pad >= 256 else n_pad
    head_step_bytes = (E * tile_n * f_pad * 2    # H tile, all views (bf16)
                       + f_pad * c_pad * 2       # W_out (bf16)
                       + c_pad * 4               # b_out (f32)
                       + tile_n * c_pad * 4)     # output tile (f32)
    out = pl.pallas_call(
        fusion_head_kernel,
        out_shape=jax.ShapeDtypeStruct((n_pad, c_pad), jnp.float32),
        grid_spec=pltpu.PrefetchScalarGridSpec(
            num_scalar_prefetch=0,
            grid=(n_pad // tile_n,),
            in_specs=[
                pl.BlockSpec(memory_space=pltpu.MemorySpace.SMEM),              # fusion weights
                pl.BlockSpec((E, tile_n, f_pad), lambda i: (0, i, 0)),          # H (all views)
                pl.BlockSpec((f_pad, c_pad), lambda i: (0, 0)),                 # W_out
                pl.BlockSpec((1, c_pad), lambda i: (0, 0)),                     # b_out (padded)
            ],
            out_specs=pl.BlockSpec((tile_n, c_pad), lambda i: (i, 0)),
        ),
        compiler_params=pltpu.CompilerParams(
            dimension_semantics=("parallel",),
            vmem_limit_bytes=_vmem_limit_bytes(head_step_bytes)),
    )(fusion_weights.astype(jnp.float32), h, wo_bf, bo)

    return out[:d["n_per"], :d["n_classes"]]


# ----------------------------------------------------------------------------
# References
# ----------------------------------------------------------------------------
def mgcn_reference_f32(adj, x, weights, biases, fw, w_out, b_out):
    """Pure-f32 reference of the original semantics (unpadded, per-view blocks)."""
    h = x.astype(jnp.float32)
    for l in range(adj.shape[0]):
        a = adj[l].astype(jnp.float32)
        d_in = jnp.maximum(jnp.sum(a, axis=-1), 1.0)
        d_out = jnp.maximum(jnp.sum(a, axis=-2), 1.0)
        a_hat = a * (d_in ** -0.5)[..., :, None] * (d_out ** -0.5)[..., None, :]
        xw = jnp.einsum('enf,fg->eng', h, weights[l])
        h = jnp.maximum(jnp.einsum('enm,emg->eng', a_hat, xw) + biases[l], 0.0)
    fused = jnp.einsum('e,enf->nf', fw, h)
    logits = fused @ w_out + b_out
    return jax.nn.log_softmax(logits, axis=-1)


def mgcn_reference_matched(adj, x, weights, biases, fw, w_out, b_out):
    """Reference that mirrors the kernels' bf16/f32 mixed precision exactly."""
    a_bf, x_bf, w_bf, b_st, wo_bf, bo, d = _prepare(
        adj, x, weights, biases, w_out, b_out)
    h = x_bf
    for l in range(d["num_layers"]):
        xw = jnp.einsum('enf,fg->eng', h, w_bf[l],
                        preferred_element_type=jnp.float32)
        agg = jnp.einsum('enm,emg->eng', a_bf[l], xw.astype(jnp.bfloat16),
                         preferred_element_type=jnp.float32)
        h = jnp.maximum(agg + b_st[l], 0.0).astype(jnp.bfloat16)
    fused = jnp.einsum('e,enf->nf', fw.astype(jnp.float32), h.astype(jnp.float32))
    logits = jnp.dot(fused.astype(jnp.bfloat16), wo_bf,
                     preferred_element_type=jnp.float32) + bo
    m = jnp.max(logits, axis=-1, keepdims=True)
    out = logits - (m + jnp.log(jnp.sum(jnp.exp(logits - m), axis=-1, keepdims=True)))
    return out[:d["n_per"], :d["n_classes"]]


# ----------------------------------------------------------------------------
# Main
# ----------------------------------------------------------------------------
if __name__ == "__main__":
    # Small configuration consistent with MGCN.__init__ (exercises node + lane padding).
    in_dim, num_hidden, num_classes = 48, 64, 10
    num_layers = 2            # -> 2 GraphConv layers + 1 FusionLayer
    n_el = 3                  # multiplex element views
    n_per = 200               # nodes per view (padded to 256 inside the kernels)

    key = jax.random.PRNGKey(0)
    k_adj, k_x, k_w1, k_w2, k_b, k_wo, k_bo = jax.random.split(key, 7)

    # Block-diagonal multiplex adjacency: one [n_el, n_per, n_per] block per layer,
    # random edges + self loops (A[i, j] == 1  <=>  edge j -> i).
    adj = (jax.random.uniform(k_adj, (num_layers, n_el, n_per, n_per)) < 0.05)
    adj = jnp.maximum(adj.astype(jnp.float32), jnp.eye(n_per, dtype=jnp.float32))

    # Node features (element-major multiplex ordering, reshaped per view).
    x = jax.random.normal(k_x, (n_el, n_per, in_dim), jnp.float32)

    # GraphConv parameters.
    w1 = jax.random.normal(k_w1, (in_dim, num_hidden), jnp.float32) / np.sqrt(in_dim)
    w2 = jax.random.normal(k_w2, (num_hidden, num_hidden), jnp.float32) / np.sqrt(num_hidden)
    b1, b2 = 0.1 * jax.random.normal(k_b, (2, num_hidden), jnp.float32)
    weights, biases = [w1, w2], [b1, b2]

    # FusionLayer parameters (one FF layer, fixed fusion weights).
    fusion_weights = jnp.array([0.5, 0.3, 0.2], jnp.float32)
    w_out = jax.random.normal(k_wo, (num_hidden, num_classes), jnp.float32) / np.sqrt(num_hidden)
    b_out = 0.1 * jax.random.normal(k_bo, (num_classes,), jnp.float32)

    out = mgcn_forward(adj, x, weights, biases, fusion_weights, w_out, b_out)
    out = jax.block_until_ready(out)

    ref_matched = mgcn_reference_matched(adj, x, weights, biases, fusion_weights,
                                         w_out, b_out)
    ref_f32 = mgcn_reference_f32(adj, x, weights, biases, fusion_weights,
                                 w_out, b_out)

    # Tight check vs a precision-matched reference (verifies kernel mechanics) ...
    np.testing.assert_allclose(np.asarray(out), np.asarray(ref_matched),
                               rtol=1e-3, atol=1e-3)
    # ... plus a looser check vs the pure-f32 semantics (verifies padding/normalization).
    np.testing.assert_allclose(np.asarray(out), np.asarray(ref_f32),
                               rtol=0.1, atol=0.1)

    print("KERNEL_OK")
</pallas_src>

<mosaic_0001>
module attributes {stable_mosaic.version = 11 : i64} {
  func.func @gcn_stack_kernel(%arg0: i32, %arg1: i32, %arg2: memref<1x256x128xbf16, #tpu.memory_space<vmem>>, %arg3: memref<1x1x256x256xbf16, #tpu.memory_space<vmem>>, %arg4: memref<1x128x128xbf16, #tpu.memory_space<vmem>>, %arg5: memref<1x1x128xf32, #tpu.memory_space<vmem>>, %arg6: memref<1x256x128xbf16, #tpu.memory_space<vmem>>) attributes {dimension_semantics = [#tpu.dimension_semantics<parallel>, #tpu.dimension_semantics<arbitrary>], iteration_bounds = array<i64: 3, 2>, scalar_prefetch = 0 : i64, scratch_operands = 0 : i64, tpu.core_type = #tpu.core_type<tc>, window_params = [{transform_indices = @transform_0, window_bounds = array<i64: 1, 256, 128>}, {transform_indices = @transform_1, window_bounds = array<i64: 1, 1, 256, 256>}, {transform_indices = @transform_2, window_bounds = array<i64: 1, 128, 128>}, {transform_indices = @transform_3, window_bounds = array<i64: 1, 1, 128>}, {transform_indices = @transform_4, window_bounds = array<i64: 1, 256, 128>}]} {
    %c0_i32 = arith.constant 0 : i32
    %0 = arith.cmpi eq, %arg1, %c0_i32 : i32
    %1 = arith.extui %0 : i1 to i32
    %c0_i32_0 = arith.constant 0 : i32
    %2 = arith.cmpi ne, %1, %c0_i32_0 : i32
    scf.if %2 {
      %c0_18 = arith.constant 0 : index
      %c0_19 = arith.constant 0 : index
      %c0_20 = arith.constant 0 : index
      %22 = vector.load %arg2[%c0_18, %c0_19, %c0_20] : memref<1x256x128xbf16, #tpu.memory_space<vmem>>, vector<1x256x128xbf16>
      %23 = vector.shape_cast %22 : vector<1x256x128xbf16> to vector<256x128xbf16>
      %c0_21 = arith.constant 0 : index
      %c0_22 = arith.constant 0 : index
      %c0_23 = arith.constant 0 : index
      %24 = vector.load %arg6[%c0_21, %c0_22, %c0_23] : memref<1x256x128xbf16, #tpu.memory_space<vmem>>, vector<1x256x128xbf16>
      %25 = vector.shape_cast %24 : vector<1x256x128xbf16> to vector<256x128xbf16>
      %26 = vector.shape_cast %23 : vector<256x128xbf16> to vector<1x256x128xbf16>
      tpu.vector_store %arg6[%c0_21, %c0_22, %c0_23], %26 {strides = array<i32>} : memref<1x256x128xbf16, #tpu.memory_space<vmem>>, vector<1x256x128xbf16>,
    } else {
    }
    %c0 = arith.constant 0 : index
    %c0_1 = arith.constant 0 : index
    %c0_2 = arith.constant 0 : index
    %3 = vector.load %arg6[%c0, %c0_1, %c0_2] : memref<1x256x128xbf16, #tpu.memory_space<vmem>>, vector<1x256x128xbf16>
    %4 = vector.shape_cast %3 : vector<1x256x128xbf16> to vector<256x128xbf16>
    %c0_3 = arith.constant 0 : index
    %c0_4 = arith.constant 0 : index
    %c0_5 = arith.constant 0 : index
    %5 = vector.load %arg4[%c0_3, %c0_4, %c0_5] : memref<1x128x128xbf16, #tpu.memory_space<vmem>>, vector<1x128x128xbf16>
    %6 = vector.shape_cast %5 : vector<1x128x128xbf16> to vector<128x128xbf16>
    %cst = arith.constant dense<0.000000e+00> : vector<256x128xf32>
    %7 = tpu.matmul %4, %6, %cst {dimension_numbers = #tpu.dot_dimension_numbers<[1], [0], [0], [1], [0, 0, 1, 1], [], []>} : vector<256x128xbf16>, vector<128x128xbf16>, vector<256x128xf32> -> vector<256x128xf32>
    %c0_6 = arith.constant 0 : index
    %c0_7 = arith.constant 0 : index
    %c0_8 = arith.constant 0 : index
    %c0_9 = arith.constant 0 : index
    %8 = vector.load %arg3[%c0_6, %c0_7, %c0_8, %c0_9] : memref<1x1x256x256xbf16, #tpu.memory_space<vmem>>, vector<1x1x256x256xbf16>
    %9 = vector.shape_cast %8 : vector<1x1x256x256xbf16> to vector<256x256xbf16>
    %10 = arith.truncf %7 : vector<256x128xf32> to vector<256x128xbf16>
    %cst_10 = arith.constant dense<0.000000e+00> : vector<256x128xf32>
    %11 = tpu.matmul %9, %10, %cst_10 {dimension_numbers = #tpu.dot_dimension_numbers<[1], [0], [0], [1], [0, 0, 1, 1], [], []>} : vector<256x256xbf16>, vector<256x128xbf16>, vector<256x128xf32> -> vector<256x128xf32>
    %c0_11 = arith.constant 0 : index
    %c0_12 = arith.constant 0 : index
    %c0_13 = arith.constant 0 : index
    %12 = vector.load %arg5[%c0_11, %c0_12, %c0_13] : memref<1x1x128xf32, #tpu.memory_space<vmem>>, vector<1x1x128xf32>
    %13 = vector.shape_cast %12 : vector<1x1x128xf32> to vector<1x128xf32>
    %14 = vector.broadcast %13 : vector<1x128xf32> to vector<256x128xf32>
    %15 = arith.addf %11, %14 : vector<256x128xf32>
    %cst_14 = arith.constant 0.000000e+00 : f32
    %16 = vector.broadcast %cst_14 : f32 to vector<256x128xf32>
    %17 = arith.maximumf %15, %16 : vector<256x128xf32>
    %18 = arith.truncf %17 : vector<256x128xf32> to vector<256x128xbf16>
    %c0_15 = arith.constant 0 : index
    %c0_16 = arith.constant 0 : index
    %c0_17 = arith.constant 0 : index
    %19 = vector.load %arg6[%c0_15, %c0_16, %c0_17] : memref<1x256x128xbf16, #tpu.memory_space<vmem>>, vector<1x256x128xbf16>
    %20 = vector.shape_cast %19 : vector<1x256x128xbf16> to vector<256x128xbf16>
    %21 = vector.shape_cast %18 : vector<256x128xbf16> to vector<1x256x128xbf16>
    tpu.vector_store %arg6[%c0_15, %c0_16, %c0_17], %21 {strides = array<i32>} : memref<1x256x128xbf16, #tpu.memory_space<vmem>>, vector<1x256x128xbf16>,
    return
  }
  func.func @transform_0(%arg0: i32, %arg1: i32) -> (i32, i32, i32) {
    %c0_i32 = arith.constant 0 : i32
    %c0_i32_0 = arith.constant 0 : i32
    %c0_i32_1 = arith.constant 0 : i32
    return %arg0, %c0_i32, %c0_i32_0 : i32, i32, i32
  }
  func.func @transform_1(%arg0: i32, %arg1: i32) -> (i32, i32, i32, i32) {
    %c0_i32 = arith.constant 0 : i32
    %c0_i32_0 = arith.constant 0 : i32
    %c0_i32_1 = arith.constant 0 : i32
    return %arg1, %arg0, %c0_i32, %c0_i32_0 : i32, i32, i32, i32
  }
  func.func @transform_2(%arg0: i32, %arg1: i32) -> (i32, i32, i32) {
    %c0_i32 = arith.constant 0 : i32
    %c0_i32_0 = arith.constant 0 : i32
    %c0_i32_1 = arith.constant 0 : i32
    return %arg1, %c0_i32, %c0_i32_0 : i32, i32, i32
  }
  func.func @transform_3(%arg0: i32, %arg1: i32) -> (i32, i32, i32) {
    %c0_i32 = arith.constant 0 : i32
    %c0_i32_0 = arith.constant 0 : i32
    %c0_i32_1 = arith.constant 0 : i32
    return %arg1, %c0_i32, %c0_i32_0 : i32, i32, i32
  }
  func.func @transform_4(%arg0: i32, %arg1: i32) -> (i32, i32, i32) {
    %c0_i32 = arith.constant 0 : i32
    %c0_i32_0 = arith.constant 0 : i32
    %c0_i32_1 = arith.constant 0 : i32
    return %arg0, %c0_i32, %c0_i32_0 : i32, i32, i32
  }
}

</mosaic_0001>

<bundles_post_ra>
// kernel: tpu_custom_call.1
= control target key start
LH: loop header
LB: loop body
LE: loop exit
PB: predicated region body
PF: predicated region fallthrough
CT: control target
= control target key end

     0   :  { %s2979_s0 = inlined_call_operand.hbm [shape: bf16[3,256,128], index: 0, kind: input, shape index: {}]   ;;  %s2980_s1 = inlined_call_operand.hbm [shape: bf16[2,3,256,256], index: 1, kind: input, shape index: {}]   ;;  %s2981_s2 = inlined_call_operand.hbm [shape: bf16[2,128,128], index: 2, kind: input, shape index: {}]   ;;  %s2982_s3 = inlined_call_operand.vmem [shape: f32[2,1,128], index: 3, kind: input, shape index: {}]   ;;  %s2983_s4 = inlined_call_operand.hbm [shape: bf16[3,256,128], index: 4, kind: output, shape index: {}]  }
   0x1   :  { %2999 = sst [smem:[#allocation21_spill]] %s2979_s0 }
   0x2   :  { %3000 = sst [smem:[#allocation22_spill]] %s2980_s1 }
   0x3   :  { %3001 = sst [smem:[#allocation23_spill]] %s2982_s3 }
   0x4   :  { %3002 = sst [smem:[#allocation24_spill]] %s2983_s4 }
   0x5   :  { %9 = vsyncpa [#allocation3], 0 }
   0x6   :  { %11 = vsyncpa [#allocation3 + $0x1], 0 }
   0x7   :  { %12 = vsyncpa [#allocation6], 0 }
   0x8   :  { %14 = vsyncpa [#allocation6 + $0x1], 0 }
   0x9   :  { %15 = vsyncpa [#allocation4], 0 }
   0xa   :  { %17 = vsyncpa [#allocation4 + $0x1], 0  ;;  %s2405_s15 = smov 0   ;;  %s2407_s16 = smov 0  }
   0xb   :  { %s2409_s17 = smov 0   ;;  %s2411_s18 = smov 0  }
   0xc   :  { %s2413_s19 = smov 0   ;;  %s2415_s20 = smov 0  }
   0xd   :  { %s2417_s21 = smov 0   ;;  %s2419_s22 = smov 0  }
   0xe   :  { %s2421_s23 = smov 0   ;;  %s2423_s24 = smov 0  }
   0xf   :  { %s2425_s25 = smov 0   ;;  %s2427_s26 = smov 0  }
  0x10   :  { %s2429_s27 = smov 0   ;;  %s2431_s28 = smov 0  }
  0x11 LB: > { %3003 = sst [smem:[#allocation13_spill]] %s2348_s23  ;;  %s2474_s29 = sadd.s32 4294967295, %s2368_s28   ;;  %s2368_s28 = sphi %s2431_s28, %s23_s28   ;;  %s2364_s27 = sphi %s2429_s27, %s3048_s27   ;;  %s2360_s26 = sphi %s2427_s26, %s3058_s26   ;;  %s2356_s25 = sphi %s2425_s25, %s3046_s25   ;;  %s2352_s24 = sphi %s2423_s24, %s3057_s24   ;;  %s2348_s23 = sphi %s2421_s23, %s3045_s23   ;;  %s2344_s22 = sphi %s2419_s22, %s3056_s22   ;;  %s2340_s21 = sphi %s2417_s21, %s3055_s21   ;;  %s2336_s20 = sphi %s2415_s20, %s3054_s20   ;;  %s2332_s19 = sphi %s2413_s19, %s3053_s19   ;;  %s2328_s18 = sphi %s2411_s18, %s3052_s18   ;;  %s2324_s17 = sphi %s2409_s17, %s3051_s17   ;;  %s2320_s16 = sphi %s2407_s16, %s3050_s16   ;;  %s2316_s15 = sphi %s2405_s15, %s3049_s15  }
  0x12   : > { %3004 = sst [smem:[#allocation14_spill]] %s2352_s24  ;;  %s32_s30 = sadd.s32 1, %s2360_s26 }
  0x13   : > { %3005 = sst [smem:[#allocation15_spill]] %s2356_s25  ;;  %p33_p0 = scmp.ge.s32.totalorder %s32_s30, 2 }
  0x14   : > { %3006 = sst [smem:[#allocation16_spill]] %s2364_s27  ;;  %s35_s5 = sadd.s32 1, %s2364_s27 }
  0x15   : > { %p2992_p1 = scmp.eq.s32.totalorder %s2368_s28, 0  ;;  %p2991_p2 = scmp.eq.s32.totalorder %s2474_s29, 0 }
  0x16   : > { %s3060_s30 = smov (%p33_p0, %s32_s30), 0  ;;  %s3062_s5 = smov (!%p33_p0, %s35_s5), %s2364_s27 }
  0x17   : > { %3007 = sst [smem:[#allocation17_spill]] %s3060_s30  ;;  %s2485_s6 = ssub.s32 %s2360_s26, %s3060_s30 }
  0x18   : > { %s70_s7 = sadd.s32 1, %s2336_s20  ;;  %p37_p3 = scmp.ge.s32.totalorder %s3062_s5, 3 }
  0x19   : > { %p77_p4 = scmp.ne.s32.totalorder %s2336_s20, %s2332_s19  ;;  %p83_p5 = scmp.ne.s32.totalorder %s2332_s19, %s2328_s18 }
  0x1a   : > { %s3064_s5 = smov (%p37_p3, %s3062_s5), 0  ;;  %p2990_p9 = scmp.lt.s32.totalorder %s2368_s28, 6 }
  0x1b   : > { %3008 = sst [smem:[#allocation18_spill]] %s3064_s5  ;;  %p2496_p7 = por %p77_p4, %p2992_p1 }
  0x1c   : > { %p2502_p8 = por %p83_p5, %p2991_p2  ;;  %s2508_s10 = ssub.s32 %s2364_s27, %s3064_s5 }
  0x1d   : > { %s67_s11 = sor.u32 %s2485_s6, %s2508_s10  ;;  %s206_s12 = sand.u32 1, %s2368_s28  }
  0x1e   : > { %s3010_s9 = scalar_select %p2502_p8, 1, 0 }
  0x1f   : > { %p68_p10 = scmp.eq.s32.totalorder %s67_s11, 0  ;;  %s208_s13 = sand.u32 1, %s2336_s20  }
  0x20   : > { %3011 = sst [smem:[#allocation19_spill]] %s3010_s9  ;;  %s1473_s18 = sshll.u32 %s208_s13, 8 }
  0x21   : > { %s2516_s14 = scalar_select %p68_p10, %s2336_s20, %s70_s7  }
  0x22   : > { %s1474_s30 = sshll.u32 %s2364_s27, 6  ;;  %s1909_s4 = smul.u32 192, %s2360_s26 }
  0x23   : > { %s210_s25 = scalar_lea.vmem [#allocation5], %s1473_s18  ;;  %p2524_p11 = pnand %p2990_p9, %p2496_p7 }
  0x24   : > { %s219_s3 = sshll.u32 %s210_s25, 4  ;;  %s216_s5 = sadd.s32 %s1909_s4, %s1474_s30  ;;  %s2528_s3 = int_to_ptr.vmem [resolvable:$true] %s219_s3 }
  0x25   : > { %s1475_s11 = sshll.u32 %s216_s5, 6  ;;  %s3013_s1 = sld [smem:[#allocation22_spill]] }
  0x26   : > { %s2536_s25 = scalar_lea.sflag [#allocation6], %s206_s12  ;;  %p2126_p0 = pneg %p2524_p11 }
  0x2b   : > { %s2533_s13 = scalar_lea.hbm %s3013_s1, %s1475_s11  ;;  %s2129_s5 = scalar_lea.hbm %s3013_s1, 24576 }
  0x2c   : > { %s2124_s8 = scalar_lea.hbm %s2533_s13, 4096  ;;  %p2130_p5 = scmp.lt.u32.totalorder %s2533_s13, %s3013_s1 }
  0x2d   : > { %p2125_p13 = scmp.ne.s32.totalorder %s2533_s13, %s2124_s8  ;;  %p2131_p7 = scmp.lt.u32.totalorder %s2129_s5, %s2124_s8 }
  0x2e   : > { %p2133_p6 = scmp.lt.u32.totalorder %s2124_s8, %s2533_s13 }
  0x2f   : > { %p2127_p3 = pnand %p2126_p0, %p2125_p13  ;;  %p2132_p10 = por %p2131_p7, %p2130_p5 }
  0x31   : > { %p2128_p4 = pneg %p2127_p3  ;;  %p2134_p9 = por %p2133_p6, %p2132_p10 }
  0x33   : > { %p2135_p2 = pnand %p2134_p9, %p2128_p4 }
  0x35   : > { %2138 = shalt.err (!%p2135_p2)
}
  0x36   : > { %s2139_s12 = scalar_lea.vmem %s2528_s3, 4096  ;;  %s2370_s11 = smov [#allocation5]  }
  0x37   : > { %p2140_p13 = scmp.ne.s32.totalorder %s2528_s3, %s2139_s12  ;;  %s2144_s7 = sshll.u32 %s2370_s11, 4  ;;  %s2145_s7 = int_to_ptr.vmem [resolvable:$false] %s2144_s7 }
  0x38   : > { %s2146_s4 = scalar_lea.vmem %s2145_s7, 8192  ;;  %p2147_p12 = scmp.lt.s32.totalorder %s2528_s3, %s2145_s7 }
  0x39   : > { %p2142_p3 = pnand %p2140_p13, %p2126_p0  ;;  %p2148_p5 = scmp.lt.s32.totalorder %s2146_s4, %s2139_s12 }
  0x3b   : > { %p2143_p1 = pneg %p2142_p3  ;;  %p2149_p7 = por %p2148_p5, %p2147_p12 }
  0x3d   : > { %p2150_p6 = pnand %p2149_p7, %p2143_p1 }
  0x3f   : > { %2153 = shalt.err (!%p2150_p6)
}
  0x40   : > { %s2371_s8 = smov 128   ;;  %s2372_s30 = smov 8  }
  0x41   : > { %1924 = dma.hbm_to_vmem [thread:$0]  (!%p2524_p11), %s2533_s13, 4096, %s2528_s3, %s2536_s25, %s2371_s8, %s2371_s8, %s2372_s30  }
  0x42   : > { %p254_p1 = scmp.lt.s32.totalorder %s2368_s28, 7  ;;  %p3014_p2 = scmp.ge.s32.totalorder %s2368_s28, 1 }
  0x43   : > { %s1467_s9 = sadd.s32 4294967294, %s2368_s28   ;;  %p40_p12 = scmp.eq.s32.totalorder %s2508_s10, 0 }
  0x44   : > { %p2567_p9 = pnand %p3014_p2, %p254_p1  ;;  %s42_s18 = sadd.s32 1, %s2348_s23 }
  0x45   : > { %p49_p0 = scmp.ne.s32.totalorder %s2348_s23, %s2344_s22  ;;  %p3017_p4 = scmp.eq.s32.totalorder %s2368_s28, 0 }
  0x46   : > { %s2577_s12 = scalar_select %p40_p12, %s2348_s23, %s42_s18  }
  0x47   : > { %p2581_p10 = por %p3017_p4, %p49_p0  ;;  %p55_p11 = scmp.ne.s32.totalorder %s2344_s22, %s2340_s21 }
  0x48   : > { %3016 = sst [smem:[#allocation20_spill]] %s2577_s12  ;;  %p159_p13 = scmp.eq.s32.totalorder %s2474_s29, 5 }
  0x49   : > { %p165_p3 = scmp.eq.s32.totalorder %s1467_s9, 5  ;;  %p3019_p5 = scmp.eq.s32.totalorder %s2474_s29, 0 }
  0x4a   : > { %s185_s24 = sand.u32 1, %s2348_s23   ;;  %p2595_p6 = por %p159_p13, %p49_p0 }
  0x4b   : > { %p2590_p7 = por %p3019_p5, %p55_p11  ;;  %p2599_p1 = por %p165_p3, %p55_p11 }
  0x4c   : > { %s3021_s10 = scalar_select %p2595_p6, 1, 0 }
  0x4d   : > { %s3020_s3 = scalar_select %p2590_p7, 1, 0 }
  0x4e   : > { %s3022_s13 = scalar_select %p2599_p1, 1, 0 }
  0x4f   : > { %s1470_s7 = sshll.u32 %s185_s24, 7  ;;  %s1579_s4 = sshll.u32 %s2364_s27, 11 }
  0x50   : > { %s3023_s0 = sld [smem:[#allocation21_spill]]  ;;  %s189_s18 = scalar_lea.vmem [#allocation2], %s1470_s7 }
  0x51   : > { %s196_s1 = sshll.u32 %s189_s18, 4  ;;  %p3024_p2 = scmp.lt.s32.totalorder %s2368_s28, 6  ;;  %s2609_s1 = int_to_ptr.vmem [resolvable:$true] %s196_s1 }
  0x52   : > { %s2619_s27 = scalar_lea.sflag [#allocation3], %s185_s24 }
  0x53   : > { %p2615_p12 = pnand %p3024_p2, %p2581_p10 }
  0x55   : > { %p2156_p4 = pneg %p2615_p12 }
  0x56   : > { %s2607_s9 = scalar_lea.hbm %s3023_s0, %s1579_s4  ;;  %s2159_s11 = scalar_lea.hbm %s3023_s0, 6144 }
  0x57   : > { %s2154_s4 = scalar_lea.hbm %s2607_s9, 2048  ;;  %p2160_p10 = scmp.lt.u32.totalorder %s2607_s9, %s3023_s0 }
  0x58   : > { %p2155_p0 = scmp.ne.s32.totalorder %s2607_s9, %s2154_s4  ;;  %p2161_p3 = scmp.lt.u32.totalorder %s2159_s11, %s2154_s4 }
  0x59   : > { %p2163_p2 = scmp.lt.u32.totalorder %s2154_s4, %s2607_s9 }
  0x5a   : > { %p2157_p11 = pnand %p2156_p4, %p2155_p0  ;;  %p2162_p5 = por %p2161_p3, %p2160_p10 }
  0x5c   : > { %p2158_p13 = pneg %p2157_p11  ;;  %p2164_p1 = por %p2163_p2, %p2162_p5 }
  0x5e   : > { %p2165_p6 = pnand %p2164_p1, %p2158_p13 }
  0x60   : > { %2168 = shalt.err (!%p2165_p6)
}
  0x61   : > { %s2169_s24 = scalar_lea.vmem %s2609_s1, 2048  ;;  %s2373_s7 = smov [#allocation2]  }
  0x62   : > { %p2170_p0 = scmp.ne.s32.totalorder %s2609_s1, %s2169_s24  ;;  %s2174_s8 = sshll.u32 %s2373_s7, 4  ;;  %s2175_s8 = int_to_ptr.vmem [resolvable:$false] %s2174_s8 }
  0x63   : > { %s2176_s30 = scalar_lea.vmem %s2175_s8, 4096  ;;  %p2177_p7 = scmp.lt.s32.totalorder %s2609_s1, %s2175_s8 }
  0x64   : > { %p2172_p11 = pnand %p2170_p0, %p2156_p4  ;;  %p2178_p10 = scmp.lt.s32.totalorder %s2176_s30, %s2169_s24 }
  0x66   : > { %p2173_p8 = pneg %p2172_p11  ;;  %p2179_p3 = por %p2178_p10, %p2177_p7 }
  0x68   : > { %p2180_p5 = pnand %p2179_p3, %p2173_p8 }
  0x6a   : > { %2183 = shalt.err (!%p2180_p5)
}
  0x6b   : > { %s2374_s4 = smov 64   ;;  %s2375_s11 = smov 4  }
  0x6c   : > { %1921 = dma.hbm_to_vmem [thread:$0]  (!%p2615_p12), %s2607_s9, 2048, %s2609_s1, %s2619_s27, %s2374_s4, %s2374_s4, %s2375_s11  }
  0x6d   : > { %s96_s18 = sadd.s32 1, %s2324_s17  ;;  %p3026_p8 = scmp.eq.s32.totalorder %s2485_s6, 0 }
  0x6e   : > { %p103_p7 = scmp.ne.s32.totalorder %s2324_s17, %s2320_s16  ;;  %p109_p6 = scmp.ne.s32.totalorder %s2320_s16, %s2316_s15 }
  0x6f   : > { %s2654_s24 = scalar_select %p3026_p8, %s2324_s17, %s96_s18  }
  0x70   : > { %s231_s7 = sand.u32 1, %s2324_s17   ;;  %s1580_s8 = sshll.u32 %s2360_s26, 10 }
  0x71   : > { %p3027_p1 = scmp.eq.s32.totalorder %s2368_s28, 0  ;;  %p3028_p13 = scmp.eq.s32.totalorder %s2474_s29, 0 }
  0x72   : > { %s1476_s12 = sshll.u32 %s231_s7, 6  ;;  %s2673_s1 = scalar_lea.hbm %s2981_s2, %s1580_s8 }
  0x73   : > { %p105_p4 = por %p103_p7, %p3027_p1  ;;  %p2666_p2 = por %p109_p6, %p3028_p13 }
  0x74   : > { %p3030_p12 = scmp.lt.s32.totalorder %s2368_s28, 6  ;;  %s233_s27 = scalar_lea.vmem [#allocation7], %s1476_s12 }
  0x75   : > { %s3029_s30 = scalar_select %p2666_p2, 1, 0 }
  0x76   : > { %p2677_p0 = pnand %p3030_p12, %p105_p4  ;;  %s240_s6 = sshll.u32 %s233_s27, 4  ;;  %s2681_s6 = int_to_ptr.vmem [resolvable:$true] %s240_s6 }
  0x77   : > { %s2184_s9 = scalar_lea.hbm %s2673_s1, 1024  ;;  %s2189_s18 = scalar_lea.hbm %s2981_s2, 2048 }
  0x78   : > { %p2185_p11 = scmp.ne.s32.totalorder %s2673_s1, %s2184_s9  ;;  %p2186_p10 = pneg %p2677_p0 }
  0x79   : > { %p2190_p8 = scmp.lt.u32.totalorder %s2673_s1, %s2981_s2  ;;  %p2191_p7 = scmp.lt.u32.totalorder %s2189_s18, %s2184_s9 }
  0x7a   : > { %p2187_p3 = pnand %p2186_p10, %p2185_p11  ;;  %p2193_p1 = scmp.lt.u32.totalorder %s2184_s9, %s2673_s1 }
  0x7b   : > { %p2192_p6 = por %p2191_p7, %p2190_p8 }
  0x7c   : > { %p2188_p5 = pneg %p2187_p3 }
  0x7d   : > { %p2194_p4 = por %p2193_p1, %p2192_p6 }
  0x7f   : > { %p2195_p13 = pnand %p2194_p4, %p2188_p5 }
  0x81   : > { %2198 = shalt.err (!%p2195_p13)
}
  0x82   : > { %s2199_s12 = scalar_lea.vmem %s2681_s6, 1024  ;;  %s2376_s27 = smov [#allocation7]  }
  0x83   : > { %p2200_p12 = scmp.ne.s32.totalorder %s2681_s6, %s2199_s12  ;;  %s2204_s0 = sshll.u32 %s2376_s27, 4  ;;  %s2205_s0 = int_to_ptr.vmem [resolvable:$false] %s2204_s0 }
  0x84   : > { %s2206_s23 = scalar_lea.vmem %s2205_s0, 2048  ;;  %p2207_p2 = scmp.lt.s32.totalorder %s2681_s6, %s2205_s0 }
  0x85   : > { %p2202_p11 = pnand %p2200_p12, %p2186_p10  ;;  %p2208_p8 = scmp.lt.s32.totalorder %s2206_s23, %s2199_s12 }
  0x87   : > { %p2203_p3 = pneg %p2202_p11  ;;  %p2209_p7 = por %p2208_p8, %p2207_p2 }
  0x89   : > { %p2210_p6 = pnand %p2209_p7, %p2203_p3 }
  0x8b   : > { %2213 = shalt.err (!%p2210_p6)
}
  0x8c   : > { %1927 = dma.hbm_to_vmem [thread:$0]  (!%p2677_p0), %s2673_s1, 1024, %s2681_s6, %s2536_s25, %s2374_s4, %s2374_s4, %s2375_s11  }
  0x8d   : > { %258 = sbr.rel (%p2567_p9) target bundleno = 819 (0x333), region = 36  ;;  %s2715_s9 = sand.u32 (!%p2567_p9), 1, %s2344_s22  }
  0x8e   : > { %s1480_s18 = sshll.u32 (!%p2567_p9), %s2715_s9, 7  ;;  %s261_s7 = scalar_lea.sflag (!%p2567_p9), [#allocation3], %s2715_s9 }
  0x8f   : > { %s2719_s8 = scalar_lea.vmem (!%p2567_p9), [#allocation2], %s1480_s18  ;;  %p3032_p2 = scmp.ne.s32.totalorder (!%p2567_p9), %s3020_s3, 0 }
  0x94   : > { %2299 = dma.done.wait (%p3032_p2), %s261_s7, 2048  }
  0x95   : > { %2301 = vsyncadd (%p3032_p2), %s261_s7, 4294965248  ;;  %s3033_s25 = sld [smem:[#allocation19_spill]]  ;;  %s269_s5 = sand.u32 1, %s2474_s29  }
  0x96   : > { %s271_s4 = sand.u32 1, %s2332_s19   ;;  %s270_s1 = scalar_lea.sflag [#allocation6], %s269_s5 }
  0x97   : > { %s1481_s11 = sshll.u32 %s271_s4, 8 }
  0x98   : > { %s2727_s15 = scalar_lea.vmem [#allocation5], %s1481_s11 }
  0x9b   : > { %p3034_p9 = scmp.ne.s32.totalorder %s3033_s25, 0 }
  0x9d   : > { %2303 = dma.done.wait (%p3034_p9), %s270_s1, 4096  }
  0x9e   : > { %2305 = vsyncadd (%p3034_p9), %s270_s1, 4294963200  ;;  %s280_s6 = sand.u32 1, %s2320_s16   ;;  %p3035_p0 = scmp.ne.s32.totalorder %s3029_s30, 0 }
  0x9f   : > { %s1482_s12 = sshll.u32 %s280_s6, 6 }
  0xa0   : > { %s2734_s3 = scalar_lea.vmem [#allocation7], %s1482_s12 }
  0xa1   : > { %2307 = dma.done.wait (%p3035_p0), %s270_s1, 1024  }
  0xa2   : > { %2309 = vsyncadd (%p3035_p0), %s270_s1, 4294966272  ;;  %s3036_s29 = sld [smem:[#allocation14_spill]]  ;;  %s3037_s7 = sld [smem:[#allocation23_spill]] }
  0xa3   : > { %s2748_s5 = scalar_lea.vmem [#allocation8], %s1480_s18 }
  0xa8   : > { %p320_p10 = scmp.lt.s32.totalorder %s3036_s29, 1  ;;  %p1484_p5 = scmp.ne.s32.totalorder %s3036_s29, 0 }
  0xa9   : > { %v328_v0 = vld [vmem:[%s2719_s8] sm:$0xff] (!%p1484_p5)   ;;  %v330_v1 = vld [vmem:[%s2719_s8 + $0x8] sm:$0xff] (!%p1484_p5)   ;;  %v332_v2 = vld [vmem:[%s2719_s8 + $0x10] sm:$0xff] (!%p1484_p5)  }
  0xaa   : > { %s2742_s27 = scalar_select %p320_p10, %s3036_s29, 1 }
  0xab   : > { %327 = sbr.rel (%p1484_p5) target bundleno = 179 (0xb3), region = 52  ;;  %360 = vst [vmem:[%s2748_s5] sm:$0xff] (!%p1484_p5), %v328_v0   ;;  %362 = vst [vmem:[%s2748_s5 + $0x8] sm:$0xff] (!%p1484_p5), %v330_v1   ;;  %v334_v3 = vld [vmem:[%s2719_s8 + $0x18] sm:$0xff] (!%p1484_p5)   ;;  %v336_v4 = vld [vmem:[%s2719_s8 + $0x20] sm:$0xff] (!%p1484_p5)  }
  0xac   : > { %s322_s25 = scalar_lea.vmem %s3037_s7, %s2742_s27  ;;  %364 = vst [vmem:[%s2748_s5 + $0x10] sm:$0xff] (!%p1484_p5), %v332_v2   ;;  %v338_v5 = vld [vmem:[%s2719_s8 + $0x28] sm:$0xff] (!%p1484_p5)   ;;  %366 = vst [vmem:[%s2748_s5 + $0x18] sm:$0xff] (!%p1484_p5), %v334_v3   ;;  %v340_v6 = vld [vmem:[%s2719_s8 + $0x30] sm:$0xff] (!%p1484_p5)  }
  0xad   : > { %368 = vst [vmem:[%s2748_s5 + $0x20] sm:$0xff] (!%p1484_p5), %v336_v4   ;;  %370 = vst [vmem:[%s2748_s5 + $0x28] sm:$0xff] (!%p1484_p5), %v338_v5   ;;  %v342_v7 = vld [vmem:[%s2719_s8 + $0x38] sm:$0xff] (!%p1484_p5)   ;;  %v344_v8 = vld [vmem:[%s2719_s8 + $0x40] sm:$0xff] (!%p1484_p5)  }
  0xae   : > { %372 = vst [vmem:[%s2748_s5 + $0x30] sm:$0xff] (!%p1484_p5), %v340_v6   ;;  %374 = vst [vmem:[%s2748_s5 + $0x38] sm:$0xff] (!%p1484_p5), %v342_v7   ;;  %v346_v9 = vld [vmem:[%s2719_s8 + $0x48] sm:$0xff] (!%p1484_p5)   ;;  %v348_v10 = vld [vmem:[%s2719_s8 + $0x50] sm:$0xff] (!%p1484_p5)  }
  0xaf   : > { %376 = vst [vmem:[%s2748_s5 + $0x40] sm:$0xff] (!%p1484_p5), %v344_v8   ;;  %v350_v11 = vld [vmem:[%s2719_s8 + $0x58] sm:$0xff] (!%p1484_p5)   ;;  %378 = vst [vmem:[%s2748_s5 + $0x48] sm:$0xff] (!%p1484_p5), %v346_v9   ;;  %v352_v12 = vld [vmem:[%s2719_s8 + $0x60] sm:$0xff] (!%p1484_p5)  }
  0xb0   : > { %380 = vst [vmem:[%s2748_s5 + $0x50] sm:$0xff] (!%p1484_p5), %v348_v10   ;;  %382 = vst [vmem:[%s2748_s5 + $0x58] sm:$0xff] (!%p1484_p5), %v350_v11   ;;  %v354_v13 = vld [vmem:[%s2719_s8 + $0x68] sm:$0xff] (!%p1484_p5)   ;;  %v356_v14 = vld [vmem:[%s2719_s8 + $0x70] sm:$0xff] (!%p1484_p5)  }
  0xb1   : > { %384 = vst [vmem:[%s2748_s5 + $0x60] sm:$0xff] (!%p1484_p5), %v352_v12   ;;  %386 = vst [vmem:[%s2748_s5 + $0x68] sm:$0xff] (!%p1484_p5), %v354_v13   ;;  %v358_v15 = vld [vmem:[%s2719_s8 + $0x78] sm:$0xff] (!%p1484_p5)  }
  0xb2   : > { %388 = vst [vmem:[%s2748_s5 + $0x70] sm:$0xff] %v356_v14   ;;  %390 = vst [vmem:[%s2748_s5 + $0x78] sm:$0xff] %v358_v15  }
  0xb3 PF: > { %v2052_v16 = vld [vmem:[%s2734_s3] sm:$0xff]   ;;  %v2053_v17 = vld [vmem:[%s2734_s3 + $0x8] sm:$0xff]   ;;  %v2054_v18 = vld [vmem:[%s2734_s3 + $0x10] sm:$0xff]   ;;  %s3039_s4 = sld [smem:[#allocation15_spill]]  ;;  %s1327_s1 = sshll.u32 %s2748_s5, 4  ;;  %s2900_s1 = int_to_ptr.vmem [resolvable:$true] %s1327_s1 }
  0xb4   : > { %1845 = vmatprep.subr.bf16.mxu0 %v2052_v16  ;;  %v2055_v19 = vld [vmem:[%s2734_s3 + $0x18] sm:$0xff]   ;;  %v2060_v20 = vld [vmem:[%s2748_s5] sm:$0xff]   ;;  %v2057_v22 = vld [vmem:[%s2734_s3 + $0x28] sm:$0xff]   ;;  %s3040_s12 = sld [smem:[#allocation24_spill]]  ;;  %s1314_s29 = scalar_lea.sflag [#allocation4], %s2715_s9 }
  0xb5   : > { %1846 = vmatpush3.bf16.msra.mxu0 %v2052_v16  ;;  %1861 = vmatprep.mubr.bf16.mxu0 %v2060_v20  ;;  %v2056_v21 = vld [vmem:[%s2734_s3 + $0x20] sm:$0xff]   ;;  %v2058_v23 = vld [vmem:[%s2734_s3 + $0x30] sm:$0xff]   ;;  %v2059_v24 = vld [vmem:[%s2734_s3 + $0x38] sm:$0xff]   ;;  %s2214_s27 = scalar_lea.vmem %s2900_s1, 2048  ;;  %p3041_p4 = scmp.ne.s32.totalorder %s3021_s10, 0 }
  0xb6   : > { %1847 = vmatprep.subr.bf16.mxu0 %v2053_v17  ;;  %v2061_v25 = vld [vmem:[%s2748_s5 + $0x8] sm:$0xff]   ;;  %v2062_v26 = vld [vmem:[%s2748_s5 + $0x10] sm:$0xff]   ;;  %v2063_v27 = vld [vmem:[%s2748_s5 + $0x18] sm:$0xff]   ;;  %p2215_p1 = scmp.ne.s32.totalorder %s2900_s1, %s2214_s27  ;;  %s2377_s0 = smov [#allocation8]  }
  0xb7   : > { %v2064_v28 = vld [vmem:[%s2748_s5 + $0x20] sm:$0xff]   ;;  %v2065_v29 = vld [vmem:[%s2748_s5 + $0x28] sm:$0xff]   ;;  %v2066_v30 = vld [vmem:[%s2748_s5 + $0x30] sm:$0xff]   ;;  %s2218_s23 = sshll.u32 %s2377_s0, 4  ;;  %s2219_s23 = int_to_ptr.vmem [resolvable:$false] %s2218_s23 }
  0xb8   : > { %v2067_v31 = vld [vmem:[%s2748_s5 + $0x38] sm:$0xff]   ;;  %v2068_v32 = vld [vmem:[%s2748_s5 + $0x40] sm:$0xff]   ;;  %v2069_v33 = vld [vmem:[%s2748_s5 + $0x48] sm:$0xff]   ;;  %p2216_p13 = pnand %p2215_p1, %p3041_p4  ;;  %s2220_s7 = scalar_lea.vmem %s2219_s23, 4096 }
  0xb9   : > { %1848 = vmatpush3.bf16.msra.mxu0 %v2053_v17  ;;  %v2070_v34 = vld [vmem:[%s2748_s5 + $0x50] sm:$0xff]   ;;  %v2071_v35 = vld [vmem:[%s2748_s5 + $0x58] sm:$0xff]   ;;  %v2072_v36 = vld [vmem:[%s2748_s5 + $0x60] sm:$0xff]   ;;  %s1613_s11 = sshll.u32 %s3039_s4, 11  ;;  %p2221_p11 = scmp.lt.s32.totalorder %s2900_s1, %s2219_s23 }
  0xba   : > { %1849 = vmatprep.subr.bf16.mxu0 %v2054_v18  ;;  %v2073_v37 = vld [vmem:[%s2748_s5 + $0x68] sm:$0xff]   ;;  %v2074_v38 = vld [vmem:[%s2748_s5 + $0x70] sm:$0xff]   ;;  %v2075_v39 = vld [vmem:[%s2748_s5 + $0x78] sm:$0xff]   ;;  %s2898_s3 = scalar_lea.hbm %s3040_s12, %s1613_s11  ;;  %p2217_p12 = pneg %p2216_p13 }
  0xbb   : > { %v2078_v40 = vld [vmem:[%s2727_s15 + $0x44] ss:$8 sps:$4 sm:$0xff]   ;;  %p2222_p3 = scmp.lt.s32.totalorder %s2220_s7, %s2214_s27 }
  0xbc   : > { %1024 = vmatprep.mubr.bf16.mxu1 %v2078_v40  ;;  %v2102_v41 = vld [vmem:[%s2727_s15 + $0x4] ss:$8 sps:$4 sm:$0xff]  }
  0xbd   : > { %1850 = vmatpush3.bf16.msra.mxu0 %v2054_v18  ;;  %v2088_v40 = vld [vmem:[%s2727_s15 + $0x84] ss:$8 sps:$4 sm:$0xff]   ;;  %p2223_p8 = por %p2222_p3, %p2221_p11 }
  0xbe   : > { %1851 = vmatprep.subr.bf16.mxu0 %v2055_v19 }
  0xbf   : > { %p2224_p7 = pnand %p2223_p8, %p2217_p12 }
  0xc1   : > { %1852 = vmatpush3.bf16.msra.mxu0 %v2055_v19 }
  0xc2   : > { %1853 = vmatprep.subr.bf16.mxu0 %v2056_v21 }
  0xc5   : > { %1854 = vmatpush3.bf16.msra.mxu0 %v2056_v21 }
  0xc6   : > { %1855 = vmatprep.subr.bf16.mxu0 %v2057_v22 }
  0xc9   : > { %1856 = vmatpush3.bf16.msra.mxu0 %v2057_v22 }
  0xca   : > { %1857 = vmatprep.subr.bf16.mxu0 %v2058_v23 }
  0xcd   : > { %1858 = vmatpush3.bf16.msra.mxu0 %v2058_v23 }
  0xce   : > { %1859 = vmatprep.subr.bf16.mxu0 %v2059_v24 }
  0xd1   : > { %1860 = vmatpush3.bf16.msra.mxu0 %v2059_v24 }
  0xd4   : > { %1862 = vmatmul.mubr.bf16.vlgmr.msra.gmra.mrb[0].mxu0 %v2061_v25 }
  0xd5   : > { %1865 = vmatprep.mubr.bf16.mxu0 %v2062_v26  ;;  %v2076_v26 = vld [vmem:[%s2727_s15 + $0x40] ss:$8 sps:$4 sm:$0xff]  }
  0xdc   : > { %1866 = vmatmul.mubr.bf16.gmra.mrb[4].mxu0 %v2063_v27  ;;  %v2100_v27 = vld [vmem:[%s2727_s15] ss:$8 sps:$4 sm:$0xff]  }
  0xdd   : > { %1869 = vmatprep.mubr.bf16.mxu0 %v2064_v28  ;;  %v2079_v28 = vld [vmem:[%s2727_s15 + $0x54] ss:$8 sps:$4 sm:$0xff]  }
  0xe4   : > { %1870 = vmatmul.mubr.bf16.gmra.mrb[8].mxu0 %v2065_v29  ;;  %v2106_v29 = vld [vmem:[%s2727_s15 + $0x14] ss:$8 sps:$4 sm:$0xff]  }
  0xe5   : > { %1873 = vmatprep.mubr.bf16.mxu0 %v2066_v30  ;;  %v2081_v30 = vld [vmem:[%s2727_s15 + $0x50] ss:$8 sps:$4 sm:$0xff]  }
  0xec   : > { %1874 = vmatmul.mubr.bf16.gmra.mrb[12].mxu0 %v2067_v31  ;;  %v2108_v31 = vld [vmem:[%s2727_s15 + $0x10] ss:$8 sps:$4 sm:$0xff]  }
  0xed   : > { %1877 = vmatprep.mubr.bf16.mxu0 %v2068_v32  ;;  %v2082_v32 = vld [vmem:[%s2727_s15 + $0x64] ss:$8 sps:$4 sm:$0xff]  }
  0xf4   : > { %1878 = vmatmul.mubr.bf16.gmra.mrb[16].mxu0 %v2069_v33  ;;  %v2112_v33 = vld [vmem:[%s2727_s15 + $0x24] ss:$8 sps:$4 sm:$0xff]  }
  0xf5   : > { %1881 = vmatprep.mubr.bf16.mxu0 %v2070_v34  ;;  %v2084_v34 = vld [vmem:[%s2727_s15 + $0x60] ss:$8 sps:$4 sm:$0xff]  }
  0xfc   : > { %1882 = vmatmul.mubr.bf16.gmra.mrb[20].mxu0 %v2071_v35  ;;  %v2114_v35 = vld [vmem:[%s2727_s15 + $0x20] ss:$8 sps:$4 sm:$0xff]  }
  0xfd   : > { %1885 = vmatprep.mubr.bf16.mxu0 %v2072_v36  ;;  %v2085_v36 = vld [vmem:[%s2727_s15 + $0x74] ss:$8 sps:$4 sm:$0xff]  }
 0x104   : > { %1886 = vmatmul.mubr.bf16.gmra.mrb[24].mxu0 %v2073_v37  ;;  %v2118_v37 = vld [vmem:[%s2727_s15 + $0x34] ss:$8 sps:$4 sm:$0xff]  }
 0x105   : > { %1889 = vmatprep.mubr.bf16.mxu0 %v2074_v38  ;;  %v2087_v38 = vld [vmem:[%s2727_s15 + $0x70] ss:$8 sps:$4 sm:$0xff]  }
 0x10c   : > { %1890 = vmatmul.mubr.bf16.gmra.mrb[28].mxu0 %v2075_v39  ;;  %v2120_v39 = vld [vmem:[%s2727_s15 + $0x30] ss:$8 sps:$4 sm:$0xff]  }
 0x10d   : > { %992 = vmatprep.mubr.bf16.mxu0 %v2102_v41  ;;  %v2090_v41 = vld [vmem:[%s2727_s15 + $0x80] ss:$8 sps:$4 sm:$0xff]  }
 0x1a7   : > { %v1863_v42 = vpop.f32.mrb[0].mxu0 }
 0x1a8   : > { %v618_v43 = vpop.f32.mrb[1].mxu0 }
 0x1a9   : > { %v1864_v44 = vpop.f32.mrb[2].mxu0 }
 0x1aa   : > { %v778_v45 = vpack.c.bf16 %v1864_v44, %v1863_v42  ;;  %v621_v46 = vpop.f32.mrb[3].mxu0  ;;  %v2091_v42 = vld [vmem:[%s2727_s15 + $0x94] ss:$8 sps:$4 sm:$0xff]   ;;  %v2094_v44 = vld [vmem:[%s2727_s15 + $0xa4] ss:$8 sps:$4 sm:$0xff]  }
 0x1ab   : > { %v777_v47 = vpack.c.bf16 %v621_v46, %v618_v43  ;;  %v2093_v43 = vld [vmem:[%s2727_s15 + $0x90] ss:$8 sps:$4 sm:$0xff]   ;;  %v2097_v46 = vld [vmem:[%s2727_s15 + $0xb4] ss:$8 sps:$4 sm:$0xff]  }
 0x1af   : > { %v1867_v48 = vpop.f32.mrb[4].mxu0 }
 0x1b0   : > { %v634_v49 = vpop.f32.mrb[5].mxu0 }
 0x1b1   : > { %v1868_v50 = vpop.f32.mrb[6].mxu0 }
 0x1b2   : > { %v780_v51 = vpack.c.bf16 %v1868_v50, %v1867_v48  ;;  %v637_v52 = vpop.f32.mrb[7].mxu0  ;;  %v2103_v48 = vld [vmem:[%s2727_s15 + $0xc4] ss:$8 sps:$4 sm:$0xff]   ;;  %v2109_v50 = vld [vmem:[%s2727_s15 + $0xd4] ss:$8 sps:$4 sm:$0xff]  }
 0x1b3   : > { %v779_v53 = vpack.c.bf16 %v637_v52, %v634_v49  ;;  %v2105_v49 = vld [vmem:[%s2727_s15 + $0xc0] ss:$8 sps:$4 sm:$0xff]   ;;  %v2115_v52 = vld [vmem:[%s2727_s15 + $0xe4] ss:$8 sps:$4 sm:$0xff]  }
 0x1b7   : > { %v1871_v54 = vpop.f32.mrb[8].mxu0 }
 0x1b8   : > { %v650_v55 = vpop.f32.mrb[9].mxu0 }
 0x1b9   : > { %v1872_v56 = vpop.f32.mrb[10].mxu0 }
 0x1ba   : > { %v782_v57 = vpack.c.bf16 %v1872_v56, %v1871_v54  ;;  %v653_v58 = vpop.f32.mrb[11].mxu0  ;;  %v2121_v54 = vld [vmem:[%s2727_s15 + $0xf4] ss:$8 sps:$4 sm:$0xff]  }
 0x1bb   : > { %v781_v59 = vpack.c.bf16 %v653_v58, %v650_v55  ;;  %v2123_v55 = vld [vmem:[%s2727_s15 + $0xf0] ss:$8 sps:$4 sm:$0xff]   ;;  %v2844_v58 = vld [vmem:[%s322_s25] ss:$0 sm:$0xff] }
 0x1bf   : > { %v1875_v60 = vpop.f32.mrb[12].mxu0 }
 0x1c0   : > { %v666_v61 = vpop.f32.mrb[13].mxu0 }
 0x1c1   : > { %v1876_v62 = vpop.f32.mrb[14].mxu0 }
 0x1c2   : > { %v784_v63 = vpack.c.bf16 %v1876_v62, %v1875_v60  ;;  %v669_v0 = vpop.f32.mrb[15].mxu0 }
 0x1c3   : > { %v783_v1 = vpack.c.bf16 %v669_v0, %v666_v61 }
 0x1c7   : > { %v1879_v2 = vpop.f32.mrb[16].mxu0 }
 0x1c8   : > { %v682_v3 = vpop.f32.mrb[17].mxu0 }
 0x1c9   : > { %v1880_v4 = vpop.f32.mrb[18].mxu0 }
 0x1ca   : > { %v786_v5 = vpack.c.bf16 %v1880_v4, %v1879_v2  ;;  %v685_v6 = vpop.f32.mrb[19].mxu0 }
 0x1cb   : > { %v785_v7 = vpack.c.bf16 %v685_v6, %v682_v3 }
 0x1cd   : > { %1733 = vmatprep.subr.bf16.mxu0 %v785_v7  ;;  %1893 = vmatprep.subr.bf16.mxu1 %v785_v7 }
 0x1ce   : > { %1734 = vmatpush3.bf16.msra.mxu0 %v777_v47  ;;  %1901 = vmatpush3.bf16.msra.mxu1 %v777_v47  ;;  %v2099_v47 = vld [vmem:[%s2727_s15 + $0xb0] ss:$8 sps:$4 sm:$0xff]  }
 0x1cf   : > { %v1883_v8 = vpop.f32.mrb[20].mxu0  ;;  %1735 = vmatprep.subr.bf16.mxu0 %v786_v5  ;;  %1894 = vmatprep.subr.bf16.mxu1 %v786_v5 }
 0x1d0   : > { %v698_v9 = vpop.f32.mrb[21].mxu0 }
 0x1d1   : > { %v1884_v10 = vpop.f32.mrb[22].mxu0 }
 0x1d2   : > { %v788_v11 = vpack.c.bf16 %v1884_v10, %v1883_v8  ;;  %v701_v12 = vpop.f32.mrb[23].mxu0  ;;  %1736 = vmatpush3.bf16.msra.mxu0 %v778_v45  ;;  %1902 = vmatpush3.bf16.msra.mxu1 %v778_v45  ;;  %v2096_v45 = vld [vmem:[%s2727_s15 + $0xa0] ss:$8 sps:$4 sm:$0xff]  }
 0x1d3   : > { %v787_v13 = vpack.c.bf16 %v701_v12, %v698_v9 }
 0x1d5   : > { %1737 = vmatprep.subr.bf16.mxu0 %v787_v13  ;;  %1895 = vmatprep.subr.bf16.mxu1 %v787_v13 }
 0x1d6   : > { %1738 = vmatpush3.bf16.msra.mxu0 %v779_v53  ;;  %1903 = vmatpush3.bf16.msra.mxu1 %v779_v53  ;;  %v2117_v53 = vld [vmem:[%s2727_s15 + $0xe0] ss:$8 sps:$4 sm:$0xff]  }
 0x1d7   : > { %v1887_v14 = vpop.f32.mrb[24].mxu0  ;;  %1739 = vmatprep.subr.bf16.mxu0 %v788_v11  ;;  %1896 = vmatprep.subr.bf16.mxu1 %v788_v11 }
 0x1d8   : > { %v714_v15 = vpop.f32.mrb[25].mxu0 }
 0x1d9   : > { %v1888_v16 = vpop.f32.mrb[26].mxu0 }
 0x1da   : > { %v790_v17 = vpack.c.bf16 %v1888_v16, %v1887_v14  ;;  %v717_v18 = vpop.f32.mrb[27].mxu0  ;;  %1740 = vmatpush3.bf16.msra.mxu0 %v780_v51  ;;  %1904 = vmatpush3.bf16.msra.mxu1 %v780_v51  ;;  %v2111_v51 = vld [vmem:[%s2727_s15 + $0xd0] ss:$8 sps:$4 sm:$0xff]  }
 0x1db   : > { %v789_v19 = vpack.c.bf16 %v717_v18, %v714_v15 }
 0x1dd   : > { %1741 = vmatprep.subr.bf16.mxu0 %v789_v19  ;;  %1897 = vmatprep.subr.bf16.mxu1 %v789_v19 }
 0x1de   : > { %1742 = vmatpush3.bf16.msra.mxu0 %v781_v59  ;;  %1905 = vmatpush3.bf16.msra.mxu1 %v781_v59 }
 0x1df   : > { %v1891_v20 = vpop.f32.mrb[28].mxu0  ;;  %1743 = vmatprep.subr.bf16.mxu0 %v790_v17  ;;  %1898 = vmatprep.subr.bf16.mxu1 %v790_v17 }
 0x1e0   : > { %v730_v21 = vpop.f32.mrb[29].mxu0 }
 0x1e1   : > { %v1892_v22 = vpop.f32.mrb[30].mxu0 }
 0x1e2   : > { %v792_v23 = vpack.c.bf16 %v1892_v22, %v1891_v20  ;;  %v733_v24 = vpop.f32.mrb[31].mxu0  ;;  %1744 = vmatpush3.bf16.msra.mxu0 %v782_v57  ;;  %1906 = vmatpush3.bf16.msra.mxu1 %v782_v57 }
 0x1e3   : > { %v791_v25 = vpack.c.bf16 %v733_v24, %v730_v21 }
 0x1e5   : > { %1745 = vmatprep.subr.bf16.mxu0 %v791_v25  ;;  %1899 = vmatprep.subr.bf16.mxu1 %v791_v25 }
 0x1e6   : > { %1746 = vmatpush3.bf16.msra.mxu0 %v783_v1  ;;  %1907 = vmatpush3.bf16.msra.mxu1 %v783_v1 }
 0x1e7   : > { %1747 = vmatprep.subr.bf16.mxu0 %v792_v23  ;;  %1900 = vmatprep.subr.bf16.mxu1 %v792_v23 }
 0x1ea   : > { %1748 = vmatpush3.bf16.msra.mxu0 %v784_v63  ;;  %1908 = vmatpush3.bf16.msra.mxu1 %v784_v63 }
 0x1ed   : > { %1025 = vmatmul.mubr.bf16.vlgmr.msra.gmra.mrb[0].mxu1 %v2076_v26  ;;  %993 = vmatmul.mubr.bf16.vlgmr.msra.gmra.mrb[32].mxu0 %v2100_v27 }
 0x1ee   : > { %1032 = vmatprep.mubr.bf16.mxu1 %v2079_v28  ;;  %1000 = vmatprep.mubr.bf16.mxu0 %v2106_v29 }
 0x1f5   : > { %1033 = vmatmul.mubr.bf16.gmra.mrb[4].mxu1 %v2081_v30  ;;  %1001 = vmatmul.mubr.bf16.gmra.mrb[36].mxu0 %v2108_v31 }
 0x1f6   : > { %1040 = vmatprep.mubr.bf16.mxu1 %v2082_v32  ;;  %1008 = vmatprep.mubr.bf16.mxu0 %v2112_v33 }
 0x1fd   : > { %1041 = vmatmul.mubr.bf16.gmra.mrb[8].mxu1 %v2084_v34  ;;  %1009 = vmatmul.mubr.bf16.gmra.mrb[40].mxu0 %v2114_v35 }
 0x1fe   : > { %1048 = vmatprep.mubr.bf16.mxu1 %v2085_v36  ;;  %1016 = vmatprep.mubr.bf16.mxu0 %v2118_v37 }
 0x205   : > { %1049 = vmatmul.mubr.bf16.gmra.mrb[12].mxu1 %v2087_v38  ;;  %1017 = vmatmul.mubr.bf16.gmra.mrb[44].mxu0 %v2120_v39 }
 0x206   : > { %1056 = vmatprep.mubr.bf16.mxu1 %v2088_v40 }
 0x20d   : > { %1057 = vmatmul.mubr.bf16.gmra.mrb[16].mxu1 %v2090_v41 }
 0x20e   : > { %1064 = vmatprep.mubr.bf16.mxu1 %v2091_v42 }
 0x215   : > { %1065 = vmatmul.mubr.bf16.gmra.mrb[20].mxu1 %v2093_v43 }
 0x216   : > { %1072 = vmatprep.mubr.bf16.mxu1 %v2094_v44 }
 0x21d   : > { %1073 = vmatmul.mubr.bf16.gmra.mrb[24].mxu1 %v2096_v45 }
 0x21e   : > { %1080 = vmatprep.mubr.bf16.mxu1 %v2097_v46 }
 0x225   : > { %1081 = vmatmul.mubr.bf16.gmra.mrb[28].mxu1 %v2099_v47 }
 0x226   : > { %1088 = vmatprep.mubr.bf16.mxu1 %v2103_v48 }
 0x22d   : > { %1089 = vmatmul.mubr.bf16.gmra.mrb[32].mxu1 %v2105_v49 }
 0x22e   : > { %1096 = vmatprep.mubr.bf16.mxu1 %v2109_v50 }
 0x235   : > { %1097 = vmatmul.mubr.bf16.gmra.mrb[36].mxu1 %v2111_v51 }
 0x236   : > { %1104 = vmatprep.mubr.bf16.mxu1 %v2115_v52 }
 0x23d   : > { %1105 = vmatmul.mubr.bf16.gmra.mrb[40].mxu1 %v2117_v53 }
 0x23e   : > { %1112 = vmatprep.mubr.bf16.mxu1 %v2121_v54 }
 0x245   : > { %1113 = vmatmul.mubr.bf16.gmra.mrb[44].mxu1 %v2123_v55 }
 0x2c0   : > { %v1773_v56 = vpop.f32.mrb[0].mxu1  ;;  %v1749_v57 = vpop.f32.mrb[32].mxu0 }
 0x2c1   : > { %v1774_v59 = vpop.f32.mrb[1].mxu1  ;;  %v1750_v60 = vpop.f32.mrb[33].mxu0 }
 0x2c2   : > { %v1775_v61 = vadd.f32 %v1774_v59, %v1773_v56  ;;  %v1776_v62 = vpop.f32.mrb[2].mxu1  ;;  %v1751_v63 = vadd.f32 %v1750_v60, %v1749_v57  ;;  %v1752_v0 = vpop.f32.mrb[34].mxu0 }
 0x2c3   : > { %v1777_v1 = vpop.f32.mrb[3].mxu1  ;;  %v1753_v2 = vpop.f32.mrb[35].mxu0 }
 0x2c4   : > { %v1027_v3 = vadd.f32 %v1775_v61, %v2844_v58  ;;  %v1778_v4 = vadd.f32 %v1777_v1, %v1776_v62  ;;  %v995_v5 = vadd.f32 %v1751_v63, %v2844_v58  ;;  %v1754_v6 = vadd.f32 %v1753_v2, %v1752_v0 }
 0x2c6   : > { %v1030_v7 = vadd.f32 %v1778_v4, %v2844_v58  ;;  %v1121_v8 = vmax.f32 %v995_v5, 0.0  ;;  %v998_v9 = vadd.f32 %v1754_v6, %v2844_v58  ;;  %v1129_v10 = vmax.f32 %v1027_v3, 0.0 }
 0x2c8   : > { %v1130_v11 = vmax.f32 %v1030_v7, 0.0  ;;  %v1779_v12 = vpop.f32.mrb[4].mxu1  ;;  %v1122_v13 = vmax.f32 %v998_v9, 0.0  ;;  %v1755_v14 = vpop.f32.mrb[36].mxu0 }
 0x2c9   : > { %v1780_v15 = vpop.f32.mrb[5].mxu1  ;;  %v1756_v16 = vpop.f32.mrb[37].mxu0 }
 0x2ca   : > { %v1637_v17 = vpack.c.bf16 %v1130_v11, %v1129_v10  ;;  %v1781_v18 = vadd.f32 %v1780_v15, %v1779_v12  ;;  %v1782_v19 = vpop.f32.mrb[6].mxu1  ;;  %v1617_v20 = vpack.c.bf16 %v1122_v13, %v1121_v8  ;;  %v1757_v21 = vadd.f32 %v1756_v16, %v1755_v14  ;;  %v1758_v22 = vpop.f32.mrb[38].mxu0 }
 0x2cb   : > { %v1783_v23 = vpop.f32.mrb[7].mxu1  ;;  %v1759_v24 = vpop.f32.mrb[39].mxu0 }
 0x2cc   : > { %1697 = vst [vmem:[%s2748_s5 + $0x20] sm:$0xff] %v1637_v17   ;;  %v1035_v25 = vadd.f32 %v1781_v18, %v2844_v58  ;;  %v1784_v26 = vadd.f32 %v1783_v23, %v1782_v19  ;;  %1618 = vst [vmem:[%s2748_s5] sm:$0xff] %v1617_v20   ;;  %v1003_v27 = vadd.f32 %v1757_v21, %v2844_v58 }
 0x2cd   : > { %v1760_v28 = vadd.f32 %v1759_v24, %v1758_v22 }
 0x2ce   : > { %v1038_v29 = vadd.f32 %v1784_v26, %v2844_v58  ;;  %v1123_v30 = vmax.f32 %v1003_v27, 0.0  ;;  %v1131_v32 = vmax.f32 %v1035_v25, 0.0 }
 0x2cf   : > { %v1006_v31 = vadd.f32 %v1760_v28, %v2844_v58 }
 0x2d0   : > { %v1132_v33 = vmax.f32 %v1038_v29, 0.0  ;;  %v1785_v34 = vpop.f32.mrb[8].mxu1  ;;  %v1761_v36 = vpop.f32.mrb[40].mxu0 }
 0x2d1   : > { %v1124_v35 = vmax.f32 %v1006_v31, 0.0  ;;  %v1786_v37 = vpop.f32.mrb[9].mxu1  ;;  %v1762_v38 = vpop.f32.mrb[41].mxu0 }
 0x2d2   : > { %v1642_v39 = vpack.c.bf16 %v1132_v33, %v1131_v32  ;;  %v1787_v40 = vadd.f32 %v1786_v37, %v1785_v34  ;;  %v1788_v41 = vpop.f32.mrb[10].mxu1  ;;  %v1763_v43 = vadd.f32 %v1762_v38, %v1761_v36  ;;  %v1764_v44 = vpop.f32.mrb[42].mxu0 }
 0x2d3   : > { %v1622_v42 = vpack.c.bf16 %v1124_v35, %v1123_v30  ;;  %v1789_v45 = vpop.f32.mrb[11].mxu1  ;;  %v1765_v46 = vpop.f32.mrb[43].mxu0 }
 0x2d4   : > { %1698 = vst [vmem:[%s2748_s5 + $0x28] sm:$0xff] %v1642_v39   ;;  %v1043_v47 = vadd.f32 %v1787_v40, %v2844_v58  ;;  %v1790_v48 = vadd.f32 %v1789_v45, %v1788_v41  ;;  %v1011_v49 = vadd.f32 %v1763_v43, %v2844_v58  ;;  %v1766_v50 = vadd.f32 %v1765_v46, %v1764_v44 }
 0x2d5   : > { %1694 = vst [vmem:[%s2748_s5 + $0x8] sm:$0xff] %v1622_v42  }
 0x2d6   : > { %v1046_v51 = vadd.f32 %v1790_v48, %v2844_v58  ;;  %v1125_v52 = vmax.f32 %v1011_v49, 0.0  ;;  %v1014_v53 = vadd.f32 %v1766_v50, %v2844_v58  ;;  %v1133_v54 = vmax.f32 %v1043_v47, 0.0 }
 0x2d8   : > { %v1134_v55 = vmax.f32 %v1046_v51, 0.0  ;;  %v1791_v56 = vpop.f32.mrb[12].mxu1  ;;  %v1126_v57 = vmax.f32 %v1014_v53, 0.0  ;;  %v1767_v59 = vpop.f32.mrb[44].mxu0 }
 0x2d9   : > { %v1792_v60 = vpop.f32.mrb[13].mxu1  ;;  %v1768_v61 = vpop.f32.mrb[45].mxu0 }
 0x2da   : > { %v1647_v62 = vpack.c.bf16 %v1134_v55, %v1133_v54  ;;  %v1793_v63 = vadd.f32 %v1792_v60, %v1791_v56  ;;  %v1794_v0 = vpop.f32.mrb[14].mxu1  ;;  %v1627_v1 = vpack.c.bf16 %v1126_v57, %v1125_v52  ;;  %v1769_v2 = vadd.f32 %v1768_v61, %v1767_v59  ;;  %v1770_v3 = vpop.f32.mrb[46].mxu0 }
 0x2db   : > { %v1795_v4 = vpop.f32.mrb[15].mxu1  ;;  %v1771_v5 = vpop.f32.mrb[47].mxu0 }
 0x2dc   : > { %1699 = vst [vmem:[%s2748_s5 + $0x30] sm:$0xff] %v1647_v62   ;;  %v1051_v6 = vadd.f32 %v1793_v63, %v2844_v58  ;;  %v1796_v7 = vadd.f32 %v1795_v4, %v1794_v0  ;;  %1695 = vst [vmem:[%s2748_s5 + $0x10] sm:$0xff] %v1627_v1   ;;  %v1019_v8 = vadd.f32 %v1769_v2, %v2844_v58 }
 0x2dd   : > { %v1772_v9 = vadd.f32 %v1771_v5, %v1770_v3 }
 0x2de   : > { %v1054_v10 = vadd.f32 %v1796_v7, %v2844_v58  ;;  %v1127_v11 = vmax.f32 %v1019_v8, 0.0  ;;  %v1135_v13 = vmax.f32 %v1051_v6, 0.0 }
 0x2df   : > { %v1022_v12 = vadd.f32 %v1772_v9, %v2844_v58 }
 0x2e0   : > { %v1136_v14 = vmax.f32 %v1054_v10, 0.0  ;;  %v1797_v15 = vpop.f32.mrb[16].mxu1 }
 0x2e1   : > { %v1128_v16 = vmax.f32 %v1022_v12, 0.0  ;;  %v1798_v17 = vpop.f32.mrb[17].mxu1 }
 0x2e2   : > { %v1652_v18 = vpack.c.bf16 %v1136_v14, %v1135_v13  ;;  %v1799_v19 = vadd.f32 %v1798_v17, %v1797_v15  ;;  %v1800_v20 = vpop.f32.mrb[18].mxu1 }
 0x2e3   : > { %v1632_v21 = vpack.c.bf16 %v1128_v16, %v1127_v11  ;;  %v1801_v22 = vpop.f32.mrb[19].mxu1 }
 0x2e4   : > { %1700 = vst [vmem:[%s2748_s5 + $0x38] sm:$0xff] %v1652_v18   ;;  %v1059_v23 = vadd.f32 %v1799_v19, %v2844_v58  ;;  %v1802_v24 = vadd.f32 %v1801_v22, %v1800_v20 }
 0x2e5   : > { %1696 = vst [vmem:[%s2748_s5 + $0x18] sm:$0xff] %v1632_v21  }
 0x2e6   : > { %v1062_v25 = vadd.f32 %v1802_v24, %v2844_v58  ;;  %v1137_v26 = vmax.f32 %v1059_v23, 0.0 }
 0x2e8   : > { %v1138_v27 = vmax.f32 %v1062_v25, 0.0  ;;  %v1803_v28 = vpop.f32.mrb[20].mxu1 }
 0x2e9   : > { %v1804_v29 = vpop.f32.mrb[21].mxu1 }
 0x2ea   : > { %v1657_v30 = vpack.c.bf16 %v1138_v27, %v1137_v26  ;;  %v1805_v31 = vadd.f32 %v1804_v29, %v1803_v28  ;;  %v1806_v32 = vpop.f32.mrb[22].mxu1 }
 0x2eb   : > { %v1807_v33 = vpop.f32.mrb[23].mxu1 }
 0x2ec   : > { %1701 = vst [vmem:[%s2748_s5 + $0x40] sm:$0xff] %v1657_v30   ;;  %v1067_v34 = vadd.f32 %v1805_v31, %v2844_v58  ;;  %v1808_v35 = vadd.f32 %v1807_v33, %v1806_v32 }
 0x2ee   : > { %v1070_v36 = vadd.f32 %v1808_v35, %v2844_v58  ;;  %v1139_v37 = vmax.f32 %v1067_v34, 0.0 }
 0x2f0   : > { %v1140_v38 = vmax.f32 %v1070_v36, 0.0  ;;  %v1809_v39 = vpop.f32.mrb[24].mxu1 }
 0x2f1   : > { %v1810_v40 = vpop.f32.mrb[25].mxu1 }
 0x2f2   : > { %v1662_v41 = vpack.c.bf16 %v1140_v38, %v1139_v37  ;;  %v1811_v42 = vadd.f32 %v1810_v40, %v1809_v39  ;;  %v1812_v43 = vpop.f32.mrb[26].mxu1 }
 0x2f3   : > { %v1813_v44 = vpop.f32.mrb[27].mxu1 }
 0x2f4   : > { %1702 = vst [vmem:[%s2748_s5 + $0x48] sm:$0xff] %v1662_v41   ;;  %v1075_v45 = vadd.f32 %v1811_v42, %v2844_v58  ;;  %v1814_v46 = vadd.f32 %v1813_v44, %v1812_v43 }
 0x2f6   : > { %v1078_v47 = vadd.f32 %v1814_v46, %v2844_v58  ;;  %v1141_v48 = vmax.f32 %v1075_v45, 0.0 }
 0x2f8   : > { %v1142_v49 = vmax.f32 %v1078_v47, 0.0  ;;  %v1815_v50 = vpop.f32.mrb[28].mxu1 }
 0x2f9   : > { %v1816_v51 = vpop.f32.mrb[29].mxu1 }
 0x2fa   : > { %v1667_v52 = vpack.c.bf16 %v1142_v49, %v1141_v48  ;;  %v1817_v53 = vadd.f32 %v1816_v51, %v1815_v50  ;;  %v1818_v54 = vpop.f32.mrb[30].mxu1 }
 0x2fb   : > { %v1819_v55 = vpop.f32.mrb[31].mxu1 }
 0x2fc   : > { %1703 = vst [vmem:[%s2748_s5 + $0x50] sm:$0xff] %v1667_v52   ;;  %v1083_v56 = vadd.f32 %v1817_v53, %v2844_v58  ;;  %v1820_v57 = vadd.f32 %v1819_v55, %v1818_v54 }
 0x2fe   : > { %v1086_v59 = vadd.f32 %v1820_v57, %v2844_v58  ;;  %v1143_v60 = vmax.f32 %v1083_v56, 0.0 }
 0x300   : > { %v1144_v61 = vmax.f32 %v1086_v59, 0.0  ;;  %v1821_v62 = vpop.f32.mrb[32].mxu1 }
 0x301   : > { %v1822_v63 = vpop.f32.mrb[33].mxu1 }
 0x302   : > { %v1672_v0 = vpack.c.bf16 %v1144_v61, %v1143_v60  ;;  %v1823_v1 = vadd.f32 %v1822_v63, %v1821_v62  ;;  %v1824_v2 = vpop.f32.mrb[34].mxu1 }
 0x303   : > { %v1825_v3 = vpop.f32.mrb[35].mxu1 }
 0x304   : > { %1704 = vst [vmem:[%s2748_s5 + $0x58] sm:$0xff] %v1672_v0   ;;  %v1091_v4 = vadd.f32 %v1823_v1, %v2844_v58  ;;  %v1826_v5 = vadd.f32 %v1825_v3, %v1824_v2 }
 0x306   : > { %v1094_v6 = vadd.f32 %v1826_v5, %v2844_v58  ;;  %v1145_v7 = vmax.f32 %v1091_v4, 0.0 }
 0x308   : > { %v1146_v8 = vmax.f32 %v1094_v6, 0.0  ;;  %v1827_v9 = vpop.f32.mrb[36].mxu1 }
 0x309   : > { %v1828_v10 = vpop.f32.mrb[37].mxu1 }
 0x30a   : > { %v1677_v11 = vpack.c.bf16 %v1146_v8, %v1145_v7  ;;  %v1829_v12 = vadd.f32 %v1828_v10, %v1827_v9  ;;  %v1830_v13 = vpop.f32.mrb[38].mxu1 }
 0x30b   : > { %v1831_v14 = vpop.f32.mrb[39].mxu1 }
 0x30c   : > { %1705 = vst [vmem:[%s2748_s5 + $0x60] sm:$0xff] %v1677_v11   ;;  %v1099_v15 = vadd.f32 %v1829_v12, %v2844_v58  ;;  %v1832_v16 = vadd.f32 %v1831_v14, %v1830_v13 }
 0x30e   : > { %v1102_v17 = vadd.f32 %v1832_v16, %v2844_v58  ;;  %v1147_v18 = vmax.f32 %v1099_v15, 0.0 }
 0x310   : > { %v1148_v19 = vmax.f32 %v1102_v17, 0.0  ;;  %v1833_v20 = vpop.f32.mrb[40].mxu1 }
 0x311   : > { %v1834_v21 = vpop.f32.mrb[41].mxu1 }
 0x312   : > { %v1682_v22 = vpack.c.bf16 %v1148_v19, %v1147_v18  ;;  %v1835_v23 = vadd.f32 %v1834_v21, %v1833_v20  ;;  %v1836_v24 = vpop.f32.mrb[42].mxu1 }
 0x313   : > { %v1837_v25 = vpop.f32.mrb[43].mxu1 }
 0x314   : > { %1706 = vst [vmem:[%s2748_s5 + $0x68] sm:$0xff] %v1682_v22   ;;  %v1107_v26 = vadd.f32 %v1835_v23, %v2844_v58  ;;  %v1838_v27 = vadd.f32 %v1837_v25, %v1836_v24 }
 0x316   : > { %v1110_v28 = vadd.f32 %v1838_v27, %v2844_v58  ;;  %v1149_v29 = vmax.f32 %v1107_v26, 0.0 }
 0x318   : > { %v1150_v30 = vmax.f32 %v1110_v28, 0.0  ;;  %v1839_v31 = vpop.f32.mrb[44].mxu1 }
 0x319   : > { %v1840_v32 = vpop.f32.mrb[45].mxu1 }
 0x31a   : > { %v1687_v33 = vpack.c.bf16 %v1150_v30, %v1149_v29  ;;  %v1841_v34 = vadd.f32 %v1840_v32, %v1839_v31  ;;  %v1842_v35 = vpop.f32.mrb[46].mxu1 }
 0x31b   : > { %v1843_v36 = vpop.f32.mrb[47].mxu1 }
 0x31c   : > { %1707 = vst [vmem:[%s2748_s5 + $0x70] sm:$0xff] %v1687_v33   ;;  %v1115_v37 = vadd.f32 %v1841_v34, %v2844_v58  ;;  %v1844_v38 = vadd.f32 %v1843_v36, %v1842_v35 }
 0x31e   : > { %v1118_v39 = vadd.f32 %v1844_v38, %v2844_v58  ;;  %v1151_v40 = vmax.f32 %v1115_v37, 0.0 }
 0x320   : > { %v1152_v41 = vmax.f32 %v1118_v39, 0.0 }
 0x322   : > { %v1692_v42 = vpack.c.bf16 %v1152_v41, %v1151_v40 }
 0x324   : > { %1708 = vst [vmem:[%s2748_s5 + $0x78] sm:$0xff] %v1692_v42  }
 0x325   : > { %2227 = shalt.err (!%p2224_p7)
}
 0x326   : > { %s2228_s25 = scalar_lea.hbm %s2898_s3, 2048  ;;  %s2232_s18 = scalar_lea.hbm %s3040_s12, 6144 }
 0x327   : > { %p2229_p6 = scmp.ne.s32.totalorder %s2898_s3, %s2228_s25  ;;  %p2233_p0 = scmp.lt.u32.totalorder %s2898_s3, %s3040_s12 }
 0x328   : > { %p2234_p10 = scmp.lt.u32.totalorder %s2232_s18, %s2228_s25  ;;  %p2236_p1 = scmp.lt.u32.totalorder %s2228_s25, %s2898_s3 }
 0x329   : > { %p2230_p2 = pnand %p2229_p6, %p3041_p4 }
 0x32a   : > { %p2235_p5 = por %p2234_p10, %p2233_p0 }
 0x32b   : > { %p2231_p9 = pneg %p2230_p2 }
 0x32c   : > { %p2237_p13 = por %p2236_p1, %p2235_p5 }
 0x32e   : > { %p2238_p12 = pnand %p2237_p13, %p2231_p9 }
 0x330   : > { %2241 = shalt.err (!%p2238_p12)
}
 0x331   : > { %s2378_s11 = smov 64   ;;  %s2379_s15 = smov 4  }
 0x332   : > { %1916 = dma.vmem_to_hbm [thread:$0]  (%p3041_p4), %s2900_s1, 2048, %s2898_s3, %s1314_s29, %s2378_s11, %s2378_s11, %s2379_s15  }
 0x333 PF: > { %p1933_p11 = scmp.ge.s32.totalorder %s2368_s28, 2  ;;  %s1342_s6 = sand.u32 1, %s2340_s21  }
 0x334   : > { %p3042_p3 = scmp.ne.s32.totalorder %s3022_s13, 0  ;;  %s1343_s27 = scalar_lea.sflag [#allocation4], %s1342_s6 }
 0x336   : > { %p1929_p8 = pnand %p1933_p11, %p3042_p3 }
 0x338   : > { %2311 = dma.done.wait (!%p1929_p8), %s1343_s27, 2048  }
 0x339   : > { %2313 = vsyncadd (!%p1929_p8), %s1343_s27, 4294965248  ;;  %s23_s28 = sadd.s32 1, %s2368_s28   ;;  %s3044_s10 = sld [smem:[#allocation13_spill]] }
 0x33a   : > { %p2932_p7 = scmp.ge.s32.totalorder %s23_s28, 8   ;;  %s3045_s23 = sld [smem:[#allocation20_spill]] }
 0x33b   : > { %s3046_s25 = sld [smem:[#allocation16_spill]]  ;;  %s3047_s13 = sld [smem:[#allocation17_spill]] }
 0x33c   : > { %s3048_s27 = sld [smem:[#allocation18_spill]]  ;;  %s3049_s15 = smov %s2320_s16 }
 0x33d   : > { %s3050_s16 = smov %s2324_s17  ;;  %s3051_s17 = smov %s2654_s24 }
 0x33e   : > { %s3052_s18 = smov %s2332_s19  ;;  %s3053_s19 = smov %s2336_s20 }
 0x33f   : > { %s3054_s20 = smov %s2516_s14  ;;  %s3055_s21 = smov %s2344_s22 }
 0x340   : > { %s3056_s22 = smov %s3044_s10  ;;  %s3057_s24 = smov %s2360_s26 }
 0x341   : > { %s3058_s26 = smov %s3047_s13  ;;  %22 = sbr.rel (!%p2932_p7) target bundleno = 17 (0x11), region = 112 }
 0x348   :  { %1348 = vsyncpa [#allocation3], 1 }
 0x349   :  { %1350 = vsyncpa [#allocation3 + $0x1], 1 }
 0x34a   :  { %1351 = vsyncpa [#allocation6], 1 }
 0x34b   :  { %1353 = vsyncpa [#allocation6 + $0x1], 1 }
 0x34c   :  { %1354 = vsyncpa [#allocation4], 1 }
 0x34d   :  { %1356 = vsyncpa [#allocation4 + $0x1], 1 }

</bundles_post_ra>
